<compile_context>
chip_gen: v5e
topology: v5e:2x2
jax: 0.10.0
libtpu: 0.0.40
codegen_flags: <defaults>
</compile_context>

<pallas_src>
import functools

import jax
import jax.numpy as jnp
from jax.experimental import pallas as pl
from jax.experimental.pallas import tpu as pltpu


def _focal_loss_kernel(y_ref, t_ref, *rest, gamma, has_alpha):
    if has_alpha:
        alpha_ref, loss_ref = rest
    else:
        (loss_ref,) = rest

    y = y_ref[...].astype(jnp.float32)                  # (TB, C)
    tb, num_classes = y.shape

    # Targets arrive lane-dense (1, TB); move to a column for the class compare.
    t_col = jnp.transpose(t_ref[...], (1, 0))            # (TB, 1) int32

    cols = jax.lax.broadcasted_iota(jnp.int32, (tb, num_classes), 1)
    mask = cols == t_col                                  # (TB, C) bool; OOB target -> all False

    # Target-logit gather first so the big f32 tile can die early.
    y_t = jnp.sum(jnp.where(mask, y, 0.0), axis=1, keepdims=True)        # (TB, 1)

    # Numerically-stable log-softmax pieces along the class (lane) axis.
    m = jnp.max(y, axis=1, keepdims=True)                                # (TB, 1)
    sez = jnp.sum(jnp.exp(y - m), axis=1, keepdims=True)                 # (TB, 1)
    z_t = y_t - m                                                        # (TB, 1)

    # Lane-densify the per-row scalars before the EUP tail and the store:
    # (TB,1) columns use 1/128 lanes per vreg; (1,TB) rows are dense.
    z_t_r = jnp.transpose(z_t, (1, 0))                    # (1, TB)
    sez_r = jnp.transpose(sez, (1, 0))                    # (1, TB)

    log_pt = z_t_r - jnp.log(sez_r)                       # (1, TB)  == log_prob[i, t[i]]
    pt = jnp.exp(log_pt)                                  # (1, TB)  == prob[i, t[i]]
    one_minus_pt = 1.0 - pt
    # TODO(synk): -expm1(log_pt) would be more accurate for pt -> 1 but deviates
    # from the torch reference (which computes 1 - softmax(y)[i, t[i]]).

    g = float(gamma)
    if g == 0.0:
        focal = jnp.ones_like(one_minus_pt)
    elif g == float(int(g)) and 1 <= int(g) <= 8:
        # Static small-integer gamma: pure VPU multiplies, no EUP power.
        focal = one_minus_pt
        for _ in range(int(g) - 1):
            focal = focal * one_minus_pt
    else:
        focal = jnp.power(one_minus_pt, jnp.float32(g))   # lane-dense, EUP

    loss = focal * log_pt                                 # (1, TB)
    if has_alpha:
        alpha = alpha_ref[...].astype(jnp.float32)        # (1, C)
        alpha_t = jnp.sum(jnp.where(mask, alpha, 0.0), axis=1, keepdims=True)  # (TB, 1)
        loss = jnp.transpose(alpha_t, (1, 0)) * loss

    loss_ref[...] = -loss                                 # dense (1, TB) store


def _budgets():
    """Returns (target logits-tile elements, vmem_limit_bytes) per TPU generation."""
    cap = None
    try:
        cap = getattr(pltpu.get_tpu_info(), "vmem_capacity_bytes", None)
    except Exception:
        cap = None
    if cap is not None and cap >= 100 * 1024 * 1024:
        # v5e / v6e: 128 MiB physical VMEM -> ~2M-element tiles (8 MiB f32 /
        # 4 MiB bf16), raised scoped-VMEM limit.
        return 2 * 1024 * 1024, 96 * 1024 * 1024
    # v7x (64 MiB per TensorCore) or unknown: conservative so double-buffered
    # input tiles + in-kernel f32 temporaries never overflow.
    return 1 * 1024 * 1024, 48 * 1024 * 1024


def _pick_batch_tile(B, C, target_elems, max_tb=None):
    """Batch-tile height: full rows, multiple of 128 (lane-dense out/targets blocks)."""
    tb = max(1, target_elems // max(1, C))
    if max_tb is not None:
        tb = min(tb, int(max_tb))
    tb = (tb // 128) * 128
    if tb < 128:
        tb = 128
    if tb >= B:
        return B          # single full-array block (block == full dims is always legal)
    return tb


def focal_loss(y, t, alpha=None, gamma=1.0, return_value=None, max_batch_tile=None):
    """Pallas TPU implementation of FocalLoss.forward(y, t).

    y: float logits [B, C] (DMA'd at native dtype, upcast to f32 in-vreg)
    t: int targets [B]
    alpha: optional per-class weights [C]
    """
    B, C = y.shape
    target_elems, vmem_limit = _budgets()
    tb = _pick_batch_tile(B, C, target_elems, max_tb=max_batch_tile)
    n_tiles = pl.cdiv(B, tb)
    b_pad = n_tiles * tb

    # Targets: lane-dense (1, B_pad) row (dense DMA, no 128x VMEM inflation).
    t_i32 = t.astype(jnp.int32)
    if b_pad != B:
        t_i32 = jnp.pad(t_i32, (0, b_pad - B))
    t_row = t_i32.reshape(1, b_pad)

    has_alpha = alpha is not None
    args = [y, t_row]
    in_specs = [
        pl.BlockSpec((tb, C), lambda i: (i, 0)),      # logits tile
        pl.BlockSpec((1, tb), lambda i: (0, i)),      # targets tile (lane-dense)
    ]
    if has_alpha:
        alpha2 = jnp.asarray(alpha, dtype=jnp.float32).reshape(1, C)
        args.append(alpha2)
        in_specs.append(pl.BlockSpec((1, C), lambda i: (0, 0)))  # alpha (resident)

    kernel = functools.partial(_focal_loss_kernel,
                               gamma=float(gamma), has_alpha=has_alpha)

    out = pl.pallas_call(
        kernel,
        out_shape=jax.ShapeDtypeStruct((1, b_pad), jnp.float32),
        grid_spec=pltpu.PrefetchScalarGridSpec(
            num_scalar_prefetch=0,
            grid=(n_tiles,),
            in_specs=in_specs,
            out_specs=pl.BlockSpec((1, tb), lambda i: (0, i)),   # lane-dense output
        ),
        compiler_params=pltpu.CompilerParams(
            # Batch tiles are independent -> shard across TCs on v7x megacore.
            dimension_semantics=("parallel",),
            vmem_limit_bytes=vmem_limit,
        ),
    )(*args)

    loss = out.reshape(b_pad)[:B]
    if return_value is None:
        return loss
    # torch.mean(loss) equivalent (glue in the wrapper).
    return jnp.mean(loss)


def _reference_focal_loss(y, t, alpha=None, gamma=1.0, return_value=None):
    y = y.astype(jnp.float32)
    log_prob = jax.nn.log_softmax(y, axis=1)
    prob = jax.nn.softmax(y, axis=1)
    b = jnp.arange(y.shape[0])
    pt = prob[b, t]
    log_pt = log_prob[b, t]
    if alpha is not None:
        a_t = jnp.asarray(alpha, jnp.float32)[t]
        loss = -a_t * (1.0 - pt) ** gamma * log_pt
    else:
        loss = -(1.0 - pt) ** gamma * log_pt
    if return_value is None:
        return loss
    return jnp.mean(loss)


if __name__ == "__main__":
    key = jax.random.PRNGKey(0)
    B, C = 8, 32
    k1, k2, k3, k4 = jax.random.split(key, 4)
    y = jax.random.normal(k1, (B, C), dtype=jnp.float32)
    t = jax.random.randint(k2, (B,), 0, C, dtype=jnp.int32)
    # Deterministic per-class alpha weights (module __init__ accepts a list).
    alpha = jnp.linspace(0.5, 1.5, C, dtype=jnp.float32)

    # Case 1: alpha=None, gamma=1.0, returnValue=None -> per-sample losses [B].
    out1 = focal_loss(y, t, alpha=None, gamma=1.0, return_value=None)
    # Case 2: alpha given, gamma=2.0, returnValue="mean" -> scalar mean.
    out2 = focal_loss(y, t, alpha=alpha, gamma=2.0, return_value="mean")
    # Case 3: non-integer gamma exercises the jnp.power fallback path.
    out3 = focal_loss(y, t, alpha=alpha, gamma=1.5, return_value=None)

    # Case 4: multi-tile grid with a padded final batch tile (3 x 128-row tiles).
    B2, C2 = 330, 16
    y2 = jax.random.normal(k3, (B2, C2), dtype=jnp.float32)
    t2 = jax.random.randint(k4, (B2,), 0, C2, dtype=jnp.int32)
    out4 = focal_loss(y2, t2, alpha=None, gamma=2.0, return_value=None,
                      max_batch_tile=128)

    jax.block_until_ready((out1, out2, out3, out4))

    ref1 = _reference_focal_loss(y, t, None, 1.0, None)
    ref2 = _reference_focal_loss(y, t, alpha, 2.0, "mean")
    ref3 = _reference_focal_loss(y, t, alpha, 1.5, None)
    ref4 = _reference_focal_loss(y2, t2, None, 2.0, None)
    assert jnp.allclose(out1, ref1, atol=1e-5, rtol=1e-5)
    assert jnp.allclose(out2, ref2, atol=1e-5, rtol=1e-5)
    assert jnp.allclose(out3, ref3, atol=1e-5, rtol=1e-5)
    assert jnp.allclose(out4, ref4, atol=1e-5, rtol=1e-5)

    print("KERNEL_OK")
</pallas_src>

<mosaic_0001>
module attributes {stable_mosaic.version = 11 : i64} {
  func.func @_focal_loss_kernel(%arg0: i32, %arg1: memref<8x32xf32, #tpu.memory_space<vmem>>, %arg2: memref<1x8xi32, #tpu.memory_space<vmem>>, %arg3: memref<1x8xf32, #tpu.memory_space<vmem>>) attributes {dimension_semantics = [#tpu.dimension_semantics<parallel>], iteration_bounds = array<i64: 1>, scalar_prefetch = 0 : i64, scratch_operands = 0 : i64, tpu.core_type = #tpu.core_type<tc>, window_params = [{transform_indices = @transform_0, window_bounds = array<i64: 8, 32>}, {transform_indices = @transform_1, window_bounds = array<i64: 1, 8>}, {transform_indices = @transform_2, window_bounds = array<i64: 1, 8>}]} {
    %c0 = arith.constant 0 : index
    %c0_0 = arith.constant 0 : index
    %0 = vector.load %arg1[%c0, %c0_0] : memref<8x32xf32, #tpu.memory_space<vmem>>, vector<8x32xf32>
    %c0_1 = arith.constant 0 : index
    %c0_2 = arith.constant 0 : index
    %1 = vector.load %arg2[%c0_1, %c0_2] : memref<1x8xi32, #tpu.memory_space<vmem>>, vector<1x8xi32>
    %2 = tpu.transpose %1, [1, 0] : vector<1x8xi32> -> vector<8x1xi32>
    %3 = tpu.iota {dimensions = array<i32: 1>} : vector<8x32xi32>
    %4 = vector.broadcast %2 : vector<8x1xi32> to vector<8x32xi32>
    %5 = arith.cmpi eq, %3, %4 : vector<8x32xi32>
    %cst = arith.constant 0.000000e+00 : f32
    %6 = vector.broadcast %cst : f32 to vector<8x32xf32>
    %7 = arith.select %5, %0, %6 : vector<8x32xi1>, vector<8x32xf32>
    %cst_3 = arith.constant dense<0.000000e+00> : vector<8xf32>
    %8 = vector.multi_reduction <add>, %7, %cst_3 [1] : vector<8x32xf32> to vector<8xf32>
    %9 = vector.shape_cast %8 : vector<8xf32> to vector<8x1xf32>
    %cst_4 = arith.constant dense<0xFF800000> : vector<8xf32>
    %10 = vector.multi_reduction <maximumf>, %0, %cst_4 [1] : vector<8x32xf32> to vector<8xf32>
    %11 = vector.shape_cast %10 : vector<8xf32> to vector<8x1xf32>
    %12 = vector.broadcast %11 : vector<8x1xf32> to vector<8x32xf32>
    %13 = arith.subf %0, %12 : vector<8x32xf32>
    %14 = math.exp %13 : vector<8x32xf32>
    %cst_5 = arith.constant dense<0.000000e+00> : vector<8xf32>
    %15 = vector.multi_reduction <add>, %14, %cst_5 [1] : vector<8x32xf32> to vector<8xf32>
    %16 = vector.shape_cast %15 : vector<8xf32> to vector<8x1xf32>
    %17 = arith.subf %9, %11 : vector<8x1xf32>
    %18 = tpu.transpose %17, [1, 0] : vector<8x1xf32> -> vector<1x8xf32>
    %19 = tpu.transpose %16, [1, 0] : vector<8x1xf32> -> vector<1x8xf32>
    %20 = math.log %19 : vector<1x8xf32>
    %21 = arith.subf %18, %20 : vector<1x8xf32>
    %22 = math.exp %21 : vector<1x8xf32>
    %cst_6 = arith.constant 1.000000e+00 : f32
    %23 = vector.broadcast %cst_6 : f32 to vector<1x8xf32>
    %24 = arith.subf %23, %22 : vector<1x8xf32>
    %25 = arith.mulf %24, %21 : vector<1x8xf32>
    %cst_7 = arith.constant 0.000000e+00 : f32
    %26 = vector.broadcast %cst_7 : f32 to vector<1x8xf32>
    %27 = arith.subf %26, %25 : vector<1x8xf32>
    %c0_8 = arith.constant 0 : index
    %c0_9 = arith.constant 0 : index
    %28 = vector.load %arg3[%c0_8, %c0_9] : memref<1x8xf32, #tpu.memory_space<vmem>>, vector<1x8xf32>
    tpu.vector_store %arg3[%c0_8, %c0_9], %27 {strides = array<i32>} : memref<1x8xf32, #tpu.memory_space<vmem>>, vector<1x8xf32>,
    return
  }
  func.func @transform_0(%arg0: i32) -> (i32, i32) {
    %c0_i32 = arith.constant 0 : i32
    %c0_i32_0 = arith.constant 0 : i32
    return %arg0, %c0_i32 : i32, i32
  }
  func.func @transform_1(%arg0: i32) -> (i32, i32) {
    %c0_i32 = arith.constant 0 : i32
    %c0_i32_0 = arith.constant 0 : i32
    return %c0_i32, %arg0 : i32, i32
  }
  func.func @transform_2(%arg0: i32) -> (i32, i32) {
    %c0_i32 = arith.constant 0 : i32
    %c0_i32_0 = arith.constant 0 : i32
    return %c0_i32, %arg0 : i32, i32
  }
}

</mosaic_0001>

<bundles_post_ra>
// kernel: tpu_custom_call.1
= control target key start
LH: loop header
LB: loop body
LE: loop exit
PB: predicated region body
PF: predicated region fallthrough
CT: control target
= control target key end

     0   :  { %7 = vsyncpa [#allocation3], 0  ;;  %s309_s0 = inlined_call_operand.hbm [shape: f32[8,32], index: 0, kind: input, shape index: {}]   ;;  %s310_s1 = inlined_call_operand.hbm [shape: s32[1,8], index: 1, kind: input, shape index: {}]   ;;  %s311_s2 = inlined_call_operand.hbm [shape: f32[1,8], index: 2, kind: output, shape index: {}]  }
   0x1   :  { %8 = vsyncpa [#allocation6], 0 }
   0x2   :  { %9 = vsyncpa [#allocation4], 0  ;;  %s15_s11 = sshll.u32 %s309_s0, 4  ;;  %s278_s12 = smov [#allocation2]   ;;  %s16_s11 = int_to_ptr.hbm [resolvable:$true] %s15_s11 }
   0x3   :  { %s17_s13 = sshll.u32 %s278_s12, 4  ;;  %s26_s16 = sshll.u32 %s310_s1, 4  ;;  %s18_s13 = int_to_ptr.vmem [resolvable:$true] %s17_s13  ;;  %s27_s16 = int_to_ptr.hbm [resolvable:$true] %s26_s16 }
   0x4   :  { %20 = dma.hbm_to_vmem [thread:$0]  %s16_s11, 128, %s18_s13, [#allocation3]  }
   0x5   :  { %s279_s17 = smov [#allocation5]  }
   0x6   :  { %s28_s18 = sshll.u32 %s279_s17, 4  ;;  %s29_s18 = int_to_ptr.vmem [resolvable:$true] %s28_s18 }
   0x7   :  { %31 = dma.hbm_to_vmem [thread:$0]  %s27_s16, 16, %s29_s18, [#allocation6]  }
   0x8   :  { %272 = dma.done.wait [#allocation3], 128  }
   0x9   :  { %273 = vsyncadd [#allocation3], 4294967168 }
   0xa   :  { %274 = dma.done.wait [#allocation6], 16  }
   0xb   :  { %275 = vsyncadd [#allocation6], 4294967280  ;;  %vm81_vm0 = vcmask 261120   ;;  %v40_v0 = vld [vmem:[#allocation2] sm:$0xff]  ;;  %v41_v2 = vld [vmem:[#allocation5] sm:$0x1]  ;;  %v74_v10 = vlaneseq }
   0xc   :  { %v85_v1 = vsel %vm81_vm0, %v40_v0, -inf  ;;  %v280_v3 = vmov 0   ;;  %s281_s0 = smov [#allocation7]   ;;  %s176_s21 = sshll.u32 %s311_s2, 4  ;;  %vm167_vm2 = vcmask 57344   ;;  %s177_s21 = int_to_ptr.hbm [resolvable:$true] %s176_s21 }
   0xd   :  { %86 = vmax.xlane.f32.xlu0 %v85_v1  ;;  %192 = vset.pattern.permute.xlu1 %v280_v3  ;;  %v75_v11 = vand.u32 127, %v74_v10  ;;  %s174_s1 = sshll.u32 %s281_s0, 4  ;;  %s175_s1 = int_to_ptr.vmem [resolvable:$true] %s174_s1 }
  0x36   :  { %42 = vxpose.xlu0.b32.start.end [1/1] (short) (narrow) %v41_v2, 8 }
  0x80   :  { %v87_v4 = vpop.xlane.xlu0 %86 }
  0x81   :  { %v88_v6 = vsub.f32 %v40_v0, %v87_v4 }
  0x83   :  { %v89_v7 = vmul.f32 1.442695, %v88_v6 }
  0x85   :  { %194 = vpow2.f32 %v89_v7 }
  0x8b   :  { %v195_v8 = vpop.eup %194 }
  0x8c   :  { %v91_v9 = vsel %vm81_vm0, %v195_v8, 0.0 }
  0xda   :  { %v58_v5 = vpop.trf.xlu0 }
  0xdb   :  { %77 = vperm.xlu1 %192, %v58_v5  }
 0x105   :  { %92 = vadd.xlane.f32.xlu1 %v91_v9 }
 0x14d   :  { %v78_v12 = vpop.permute.xlu1 %77 }
 0x14e   :  { %vm79_vm1 = vcmp.eq.s32.totalorder %v75_v11, %v78_v12 }
 0x14f   :  { %v80_v13 = vsel %vm79_vm1, %v40_v0, 0.0 }
 0x150   :  { %v82_v14 = vsel %vm81_vm0, %v80_v13, 0.0 }
 0x151   :  { %83 = vadd.xlane.f32.xlu2 %v82_v14 }
 0x178   :  { %v93_v15 = vpop.xlane.xlu1 %92 }
 0x17a   :  { %127 = vxpose.xlu2.b32.start.end [1/1] (short) (narrow) %v93_v15, 8 }
 0x1c4   :  { %v84_v16 = vpop.xlane.xlu2 %83 }
 0x1c5   :  { %v94_v17 = vsub.f32 %v84_v16, %v87_v4 }
 0x1c7   :  { %95 = vxpose.xlu0.b32.start.end [1/1] (short) (narrow) %v94_v17, 8 }
 0x213   :  { %v143_v18 = vpop.trf.xlu2 }
 0x214   :  { %196 = vlog2.f32 %v143_v18 }
 0x21a   :  { %v197_v19 = vpop.eup %196 }
 0x21b   :  { %v160_v20 = vmul.f32 0.6931472, %v197_v19 }
 0x22e   :  { %193 = vset.pattern.permute.xlu0 %v280_v3 }
 0x26b   :  { %v111_v21 = vpop.trf.xlu0 }
 0x26c   :  { %v161_v22 = vsub.f32 %v111_v21, %v160_v20 }
 0x26e   :  { %v162_v23 = vmul.f32 1.442695, %v161_v22 }
 0x270   :  { %198 = vpow2.f32 %v162_v23 }
 0x276   :  { %v199_v24 = vpop.eup %198 }
 0x277   :  { %v164_v25 = vsub.f32 1.0, %v199_v24 }
 0x279   :  { %v165_v26 = vmul.f32 %v164_v25, %v161_v22 }
 0x27b   :  { %v166_v27 = vsub.f32 0.0, %v165_v26 }
 0x27d   :  { %168 = vst.msk [vmem:[#allocation7] sm:$0x1] %vm167_vm2, %v166_v27 }
 0x27e   :  { %179 = dma.vmem_to_hbm [thread:$0]  %s175_s1, 16, %s177_s21, [#allocation4]  }
 0x27f   :  { %276 = dma.done.wait [#allocation4], 16  }
 0x280   :  { %277 = vsyncadd [#allocation4], 4294967280 }
 0x281   :  { %184 = vsyncpa [#allocation3], 1 }
 0x282   :  { %185 = vsyncpa [#allocation6], 1 }
 0x283   :  { %186 = vsyncpa [#allocation4], 1 }

</bundles_post_ra>
